<compile_context>
chip_gen: v7x
topology: tpu7x:2x2x1
jax: 0.10.0
libtpu: 0.0.40
codegen_flags: <defaults>
</compile_context>

<pallas_src>
import jax
import jax.numpy as jnp
from jax.experimental import pallas as pl
from jax.experimental.pallas import tpu as pltpu

INPUT_SIZE = 28 * 28   # 784
HIDDEN = 128
OUT = 10


def _chip_defaults():
    """Per-generation (batch-tile cap, scoped-VMEM limit)."""
    try:
        kind = jax.devices()[0].device_kind.lower()
    except Exception:
        kind = ""
    if "v6" in kind:
        # v6e: 128 MiB physical VMEM, ~1.4 TB/s HBM -> 4096-row f32 tiles
        # (~14 MiB x2 buffers) cut per-step overhead to ~4%; needs the scoped
        # limit raised above the 32 MiB default.
        return 4096, 64 << 20
    # v5e (16 MiB default scoped limit) and v7x (64 MiB physical VMEM, 2 TCs):
    # 2048-row f32 tiles double-buffered (~16 MiB incl. outputs/weights) ->
    # raise the scoped limit a little, stay well under physical VMEM.
    return 2048, 40 << 20


_TB_CAP, _VMEM_LIMIT = _chip_defaults()


def _pick_tb(rows, tb_cap=_TB_CAP):
    """Batch-tile size.

    Small batches: one tile covering the whole batch (block == full dim, so the
    (8,128) constraint is satisfied regardless of B).  Larger batches: split
    into an even number of >=2 tiles, each a multiple of 8 rows and <= tb_cap,
    so v7x's two TensorCores both get (balanced) work; the ragged last tile is
    handled by the grid, no padding."""
    if rows <= 512:
        return rows
    n_tiles = max(2, -(-rows // tb_cap))
    if n_tiles % 2:
        n_tiles += 1
    tb = -(-rows // n_tiles)
    return ((tb + 7) // 8) * 8


def _mlp_kernel(x_ref, w1_ref, b1_ref, w2_ref, b2_ref, o_ref):
    # x_ref : (TB, 784)  VMEM, f32   (one batch tile per grid step, pipelined)
    # w1_ref: (784, 128) VMEM, bf16  (resident across all grid steps)
    # b1_ref: (1, 128)   VMEM, f32   (resident)
    # w2_ref: (128, 10)  VMEM, bf16  (resident)
    # b2_ref: (1, 10)    VMEM, f32   (resident)
    # o_ref : (TB, 10)   VMEM, f32
    # In-kernel cast to bf16 for the MXU (VPU work, hidden under the x DMA);
    # accumulation stays f32 via preferred_element_type.
    x = x_ref[...].astype(jnp.bfloat16)

    h = jnp.dot(x, w1_ref[...], preferred_element_type=jnp.float32)
    h = jnp.maximum(h + b1_ref[...], 0.0)          # bias broadcast + ReLU, f32

    y = jnp.dot(h.astype(jnp.bfloat16), w2_ref[...],
                preferred_element_type=jnp.float32)
    o_ref[...] = (y + b2_ref[...]).astype(o_ref.dtype)


@jax.jit
def simple_nn_forward(x_nchw, w1, b1, w2, b2):
    """x_nchw: (B, 1, 28, 28) f32.  w1: (784,128), b1: (128,), w2: (128,10), b2: (10,)."""
    B = x_nchw.shape[0]
    x = x_nchw.reshape(B, INPUT_SIZE)        # == torch x.view(-1, 28*28); stays f32

    tb = _pick_tb(B)
    num_tiles = pl.cdiv(B, tb)

    # Tiny parameter casts only (x is NOT touched in the wrapper).
    w1_bf16 = w1.astype(jnp.bfloat16)
    w2_bf16 = w2.astype(jnp.bfloat16)
    b1_2d = b1.reshape(1, HIDDEN).astype(jnp.float32)
    b2_2d = b2.reshape(1, OUT).astype(jnp.float32)

    flops = 2 * B * (INPUT_SIZE * HIDDEN + HIDDEN * OUT)
    bytes_accessed = (
        B * INPUT_SIZE * 4                           # x (f32, single pass)
        + (INPUT_SIZE * HIDDEN + HIDDEN * OUT) * 2   # weights (bf16, once)
        + (HIDDEN + OUT) * 4                         # biases (f32)
        + B * OUT * 4                                # output (f32)
    )

    out = pl.pallas_call(
        _mlp_kernel,
        out_shape=jax.ShapeDtypeStruct((B, OUT), jnp.float32),
        grid=(num_tiles,),
        in_specs=[
            # x: one batch tile per grid step (auto double-buffered pipeline).
            pl.BlockSpec((tb, INPUT_SIZE), lambda i: (i, 0)),
            # Weights/biases: block index never changes -> VMEM resident,
            # fetched from HBM exactly once.
            pl.BlockSpec((INPUT_SIZE, HIDDEN), lambda i: (0, 0)),
            pl.BlockSpec((1, HIDDEN), lambda i: (0, 0)),
            pl.BlockSpec((HIDDEN, OUT), lambda i: (0, 0)),
            pl.BlockSpec((1, OUT), lambda i: (0, 0)),
        ],
        # OUT=10 is the full array width -> writeback DMA is already contiguous;
        # deliberately NOT padded to 128 lanes (would inflate output bytes ~13x).
        out_specs=pl.BlockSpec((tb, OUT), lambda i: (i, 0)),
        compiler_params=pltpu.CompilerParams(
            dimension_semantics=("parallel",),
            vmem_limit_bytes=_VMEM_LIMIT),
        cost_estimate=pl.CostEstimate(
            flops=flops, transcendentals=0, bytes_accessed=bytes_accessed),
    )(x, w1_bf16, b1_2d, w2_bf16, b2_2d)

    return out


def _init_params(key):
    """Deterministic init mimicking torch.nn.Linear defaults
    (U[-1/sqrt(fan_in), +1/sqrt(fan_in)]); weights stored as (in, out)."""
    k1, k2, k3, k4 = jax.random.split(key, 4)
    bound1 = 1.0 / jnp.sqrt(INPUT_SIZE)
    bound2 = 1.0 / jnp.sqrt(HIDDEN)
    w1 = jax.random.uniform(k1, (INPUT_SIZE, HIDDEN), jnp.float32, -bound1, bound1)
    b1 = jax.random.uniform(k2, (HIDDEN,), jnp.float32, -bound1, bound1)
    w2 = jax.random.uniform(k3, (HIDDEN, OUT), jnp.float32, -bound2, bound2)
    b2 = jax.random.uniform(k4, (OUT,), jnp.float32, -bound2, bound2)
    return w1, b1, w2, b2


if __name__ == "__main__":
    key = jax.random.PRNGKey(0)
    k_x, k_p = jax.random.split(key)

    B = 8
    x = jax.random.normal(k_x, (B, 1, 28, 28), dtype=jnp.float32)  # NCHW, MNIST-like
    w1, b1, w2, b2 = _init_params(k_p)

    out = jax.block_until_ready(simple_nn_forward(x, w1, b1, w2, b2))
    assert out.shape == (B, OUT)

    # Reference check in plain JAX (same math as the PyTorch forward), f32.
    # Tolerance is relaxed because the kernel feeds the MXU bf16 operands
    # (accumulation is still f32).
    x_flat = x.reshape(B, INPUT_SIZE)
    ref = jnp.maximum(x_flat @ w1 + b1, 0.0) @ w2 + b2
    assert jnp.allclose(out, ref, atol=5e-2, rtol=5e-2), (
        jnp.max(jnp.abs(out - ref)))

    print("KERNEL_OK")
</pallas_src>

<mosaic_0001>
module attributes {stable_mosaic.version = 11 : i64} {
  func.func @_mlp_kernel(%arg0: i32, %arg1: memref<8x784xf32, #tpu.memory_space<vmem>>, %arg2: memref<784x128xbf16, #tpu.memory_space<vmem>>, %arg3: memref<1x128xf32, #tpu.memory_space<vmem>>, %arg4: memref<128x10xbf16, #tpu.memory_space<vmem>>, %arg5: memref<1x10xf32, #tpu.memory_space<vmem>>, %arg6: memref<8x10xf32, #tpu.memory_space<vmem>>) attributes {dimension_semantics = [#tpu.dimension_semantics<parallel>], iteration_bounds = array<i64: 1>, scalar_prefetch = 0 : i64, scratch_operands = 0 : i64, tpu.core_type = #tpu.core_type<tc>, window_params = [{transform_indices = @transform_0, window_bounds = array<i64: 8, 784>}, {pipeline_mode = #tpu.pipeline_mode<synchronous>, transform_indices = @transform_1, window_bounds = array<i64: 784, 128>}, {pipeline_mode = #tpu.pipeline_mode<synchronous>, transform_indices = @transform_2, window_bounds = array<i64: 1, 128>}, {pipeline_mode = #tpu.pipeline_mode<synchronous>, transform_indices = @transform_3, window_bounds = array<i64: 128, 10>}, {pipeline_mode = #tpu.pipeline_mode<synchronous>, transform_indices = @transform_4, window_bounds = array<i64: 1, 10>}, {transform_indices = @transform_5, window_bounds = array<i64: 8, 10>}]} {
    %c0 = arith.constant 0 : index
    %c0_0 = arith.constant 0 : index
    %0 = vector.load %arg1[%c0, %c0_0] : memref<8x784xf32, #tpu.memory_space<vmem>>, vector<8x784xf32>
    %1 = arith.truncf %0 : vector<8x784xf32> to vector<8x784xbf16>
    %c0_1 = arith.constant 0 : index
    %c0_2 = arith.constant 0 : index
    %2 = vector.load %arg2[%c0_1, %c0_2] : memref<784x128xbf16, #tpu.memory_space<vmem>>, vector<784x128xbf16>
    %cst = arith.constant dense<0.000000e+00> : vector<8x128xf32>
    %3 = tpu.matmul %1, %2, %cst {dimension_numbers = #tpu.dot_dimension_numbers<[1], [0], [0], [1], [0, 0, 1, 1], [], []>} : vector<8x784xbf16>, vector<784x128xbf16>, vector<8x128xf32> -> vector<8x128xf32>
    %c0_3 = arith.constant 0 : index
    %c0_4 = arith.constant 0 : index
    %4 = vector.load %arg3[%c0_3, %c0_4] : memref<1x128xf32, #tpu.memory_space<vmem>>, vector<1x128xf32>
    %5 = vector.broadcast %4 : vector<1x128xf32> to vector<8x128xf32>
    %6 = arith.addf %3, %5 : vector<8x128xf32>
    %cst_5 = arith.constant 0.000000e+00 : f32
    %7 = vector.broadcast %cst_5 : f32 to vector<8x128xf32>
    %8 = arith.maximumf %6, %7 : vector<8x128xf32>
    %9 = arith.truncf %8 : vector<8x128xf32> to vector<8x128xbf16>
    %c0_6 = arith.constant 0 : index
    %c0_7 = arith.constant 0 : index
    %10 = vector.load %arg4[%c0_6, %c0_7] : memref<128x10xbf16, #tpu.memory_space<vmem>>, vector<128x10xbf16>
    %cst_8 = arith.constant dense<0.000000e+00> : vector<8x10xf32>
    %11 = tpu.matmul %9, %10, %cst_8 {dimension_numbers = #tpu.dot_dimension_numbers<[1], [0], [0], [1], [0, 0, 1, 1], [], []>} : vector<8x128xbf16>, vector<128x10xbf16>, vector<8x10xf32> -> vector<8x10xf32>
    %c0_9 = arith.constant 0 : index
    %c0_10 = arith.constant 0 : index
    %12 = vector.load %arg5[%c0_9, %c0_10] : memref<1x10xf32, #tpu.memory_space<vmem>>, vector<1x10xf32>
    %13 = vector.broadcast %12 : vector<1x10xf32> to vector<8x10xf32>
    %14 = arith.addf %11, %13 : vector<8x10xf32>
    %c0_11 = arith.constant 0 : index
    %c0_12 = arith.constant 0 : index
    %15 = vector.load %arg6[%c0_11, %c0_12] : memref<8x10xf32, #tpu.memory_space<vmem>>, vector<8x10xf32>
    tpu.vector_store %arg6[%c0_11, %c0_12], %14 {strides = array<i32>} : memref<8x10xf32, #tpu.memory_space<vmem>>, vector<8x10xf32>,
    return
  }
  func.func @transform_0(%arg0: i32) -> (i32, i32) {
    %c0_i32 = arith.constant 0 : i32
    %c0_i32_0 = arith.constant 0 : i32
    return %arg0, %c0_i32 : i32, i32
  }
  func.func @transform_1(%arg0: i32) -> (i32, i32) {
    %c0_i32 = arith.constant 0 : i32
    %c0_i32_0 = arith.constant 0 : i32
    %c0_i32_1 = arith.constant 0 : i32
    return %c0_i32, %c0_i32_0 : i32, i32
  }
  func.func @transform_2(%arg0: i32) -> (i32, i32) {
    %c0_i32 = arith.constant 0 : i32
    %c0_i32_0 = arith.constant 0 : i32
    %c0_i32_1 = arith.constant 0 : i32
    return %c0_i32, %c0_i32_0 : i32, i32
  }
  func.func @transform_3(%arg0: i32) -> (i32, i32) {
    %c0_i32 = arith.constant 0 : i32
    %c0_i32_0 = arith.constant 0 : i32
    %c0_i32_1 = arith.constant 0 : i32
    return %c0_i32, %c0_i32_0 : i32, i32
  }
  func.func @transform_4(%arg0: i32) -> (i32, i32) {
    %c0_i32 = arith.constant 0 : i32
    %c0_i32_0 = arith.constant 0 : i32
    %c0_i32_1 = arith.constant 0 : i32
    return %c0_i32, %c0_i32_0 : i32, i32
  }
  func.func @transform_5(%arg0: i32) -> (i32, i32) {
    %c0_i32 = arith.constant 0 : i32
    %c0_i32_0 = arith.constant 0 : i32
    return %arg0, %c0_i32 : i32, i32
  }
}

</mosaic_0001>

<bundles_post_ra>
// kernel: simple_nn_forward.1
= control target key start
LH: loop header
LB: loop body
LE: loop exit
PB: predicated region body
PF: predicated region fallthrough
CT: control target
= control target key end

     0   :  { %v975_v44 = vmov 0.0   ;;  %vm976_vm0 = vmmov 0   ;;  %vm435_vm1 = vcmask 130048   ;;  %s1231_s0 = inlined_call_operand.vmem [shape: f32[8,784], index: 0, kind: input, shape index: {}]   ;;  %s1232_s1 = inlined_call_operand.vmem [shape: bf16[784,128], index: 1, kind: input, shape index: {}]   ;;  %s1233_s2 = inlined_call_operand.vmem [shape: f32[1,128], index: 2, kind: input, shape index: {}]   ;;  %s1234_s3 = inlined_call_operand.vmem [shape: bf16[128,10], index: 3, kind: input, shape index: {}]   ;;  %s1235_s4 = inlined_call_operand.vmem [shape: f32[1,10], index: 4, kind: input, shape index: {}]   ;;  %s1236_s5 = inlined_call_operand.hbm [shape: f32[8,10], index: 5, kind: output, shape index: {}]  }
   0x1   :  { %v894_v0 = vld [vmem:[%s1232_s1 + $0x40] sm:$0xff]   ;;  %v898_v4 = vld [vmem:[%s1232_s1 + $0x48] sm:$0xff]   ;;  %v902_v8 = vld [vmem:[%s1232_s1 + $0x50] sm:$0xff]  }
   0x2   :  { %v895_v1 = vld [vmem:[%s1232_s1] sm:$0xff]   ;;  %788 = vmatprep.subr.bf16.mxu0 %v894_v0  ;;  %v899_v5 = vld [vmem:[%s1232_s1 + $0x8] sm:$0xff]   ;;  %v903_v9 = vld [vmem:[%s1232_s1 + $0x10] sm:$0xff]  }
   0x3   :  { %v896_v2 = vld [vmem:[%s1232_s1 + $0xc0] sm:$0xff]   ;;  %789 = vmatpush3.bf16.msra.mxu0 %v895_v1  ;;  %v900_v6 = vld [vmem:[%s1232_s1 + $0xc8] sm:$0xff]   ;;  %v904_v10 = vld [vmem:[%s1232_s1 + $0xd0] sm:$0xff]  }
   0x4   :  { %v897_v3 = vld [vmem:[%s1232_s1 + $0x80] sm:$0xff]   ;;  %810 = vmatprep.subr.bf16.mxu1 %v896_v2  ;;  %790 = vmatprep.subr.bf16.mxu0 %v898_v4  ;;  %v901_v7 = vld [vmem:[%s1232_s1 + $0x88] sm:$0xff]   ;;  %v905_v11 = vld [vmem:[%s1232_s1 + $0x90] sm:$0xff]  }
   0x5   :  { %811 = vmatpush3.bf16.msra.mxu1 %v897_v3  ;;  %v906_v12 = vld [vmem:[%s1232_s1 + $0x58] sm:$0xff]   ;;  %v910_v16 = vld [vmem:[%s1232_s1 + $0x60] sm:$0xff]   ;;  %v914_v20 = vld [vmem:[%s1232_s1 + $0x68] sm:$0xff]  }
   0x6   :  { %812 = vmatprep.subr.bf16.mxu1 %v900_v6  ;;  %v907_v13 = vld [vmem:[%s1232_s1 + $0x18] sm:$0xff]   ;;  %v911_v17 = vld [vmem:[%s1232_s1 + $0x20] sm:$0xff]   ;;  %v915_v21 = vld [vmem:[%s1232_s1 + $0x28] sm:$0xff]  }
   0x7   :  { %791 = vmatpush3.bf16.msra.mxu0 %v899_v5  ;;  %v908_v14 = vld [vmem:[%s1232_s1 + $0xd8] sm:$0xff]   ;;  %v912_v18 = vld [vmem:[%s1232_s1 + $0xe0] sm:$0xff]   ;;  %v916_v22 = vld [vmem:[%s1232_s1 + $0xe8] sm:$0xff]  }
   0x8   :  { %792 = vmatprep.subr.bf16.mxu0 %v902_v8  ;;  %v909_v15 = vld [vmem:[%s1232_s1 + $0x98] sm:$0xff]   ;;  %v913_v19 = vld [vmem:[%s1232_s1 + $0xa0] sm:$0xff]   ;;  %v917_v23 = vld [vmem:[%s1232_s1 + $0xa8] sm:$0xff]  }
   0x9   :  { %813 = vmatpush3.bf16.msra.mxu1 %v901_v7  ;;  %v918_v24 = vld [vmem:[%s1232_s1 + $0x70] sm:$0xff]   ;;  %v922_v28 = vld [vmem:[%s1232_s1 + $0x78] sm:$0xff]   ;;  %v23_v31 = vld [vmem:[%s1231_s0 + $0x8] sm:$0xff] }
   0xa   :  { %814 = vmatprep.subr.bf16.mxu1 %v904_v10  ;;  %v919_v25 = vld [vmem:[%s1232_s1 + $0x30] sm:$0xff]   ;;  %v923_v29 = vld [vmem:[%s1232_s1 + $0x38] sm:$0xff]   ;;  %v30_v32 = vpack.c.bf16 %v23_v31, %v23_v31  ;;  %v22_v34 = vld [vmem:[%s1231_s0] sm:$0xff] }
   0xb   :  { %793 = vmatpush3.bf16.msra.mxu0 %v903_v9  ;;  %v920_v26 = vld [vmem:[%s1232_s1 + $0xf0] sm:$0xff]   ;;  %v924_v30 = vld [vmem:[%s1232_s1 + $0xf8] sm:$0xff]   ;;  %v29_v35 = vpack.c.bf16 %v22_v34, %v22_v34  ;;  %v926_v36 = vld [vmem:[%s1232_s1 + $0x140] sm:$0xff]  }
   0xc   :  { %794 = vmatprep.subr.bf16.mxu0 %v906_v12  ;;  %v921_v27 = vld [vmem:[%s1232_s1 + $0xb0] sm:$0xff]   ;;  %v925_v33 = vld [vmem:[%s1232_s1 + $0xb8] sm:$0xff]   ;;  %471 = vmatprep.mubr.bf16.mxu0 %v30_v32  ;;  %v927_v39 = vld [vmem:[%s1232_s1 + $0x100] sm:$0xff]  }
   0xd   :  { %815 = vmatpush3.bf16.msra.mxu1 %v905_v11  ;;  %v25_v37 = vld [vmem:[%s1231_s0 + $0x18] sm:$0xff]  ;;  %v24_v40 = vld [vmem:[%s1231_s0 + $0x10] sm:$0xff]  ;;  %v928_v42 = vld [vmem:[%s1232_s1 + $0x148] sm:$0xff]  }
   0xe   :  { %816 = vmatprep.subr.bf16.mxu1 %v908_v14  ;;  %v32_v38 = vpack.c.bf16 %v25_v37, %v25_v37  ;;  %v31_v41 = vpack.c.bf16 %v24_v40, %v24_v40  ;;  %v929_v43 = vld [vmem:[%s1232_s1 + $0x108] sm:$0xff]   ;;  %v930_v45 = vld [vmem:[%s1232_s1 + $0x150] sm:$0xff]   ;;  %v932_v47 = vld [vmem:[%s1232_s1 + $0x158] sm:$0xff]  }
   0xf   :  { %795 = vmatpush3.bf16.msra.mxu0 %v907_v13  ;;  %v931_v46 = vld [vmem:[%s1232_s1 + $0x110] sm:$0xff]   ;;  %v933_v48 = vld [vmem:[%s1232_s1 + $0x118] sm:$0xff]   ;;  %v934_v49 = vld [vmem:[%s1232_s1 + $0x160] sm:$0xff]  }
  0x10   :  { %796 = vmatprep.subr.bf16.mxu0 %v910_v16  ;;  %511 = vmatprep.mubr.bf16.mxu1 %v32_v38  ;;  %v935_v50 = vld [vmem:[%s1232_s1 + $0x120] sm:$0xff]   ;;  %v936_v51 = vld [vmem:[%s1232_s1 + $0x168] sm:$0xff]   ;;  %v938_v55 = vld [vmem:[%s1232_s1 + $0x170] sm:$0xff]  }
  0x11   :  { %817 = vmatpush3.bf16.msra.mxu1 %v909_v15  ;;  %v937_v52 = vld [vmem:[%s1232_s1 + $0x128] sm:$0xff]   ;;  %v942_v53 = vld [vmem:[%s1232_s1 + $0x180] sm:$0xff]   ;;  %v28_v57 = vld [vmem:[%s1231_s0 + $0x30] sm:$0xff] }
  0x12   :  { %818 = vmatprep.subr.bf16.mxu1 %v912_v18  ;;  %v27_v54 = vld [vmem:[%s1231_s0 + $0x28] sm:$0xff]  ;;  %v35_v58 = vpack.c.bf16 %v28_v57, %v28_v57  ;;  %v939_v59 = vld [vmem:[%s1232_s1 + $0x130] sm:$0xff]  }
  0x13   :  { %797 = vmatpush3.bf16.msra.mxu0 %v911_v17  ;;  %v34_v56 = vpack.c.bf16 %v27_v54, %v27_v54 }
  0x14   :  { %798 = vmatprep.subr.bf16.mxu0 %v914_v20 }
  0x15   :  { %819 = vmatpush3.bf16.msra.mxu1 %v913_v19 }
  0x16   :  { %820 = vmatprep.subr.bf16.mxu1 %v916_v22 }
  0x17   :  { %799 = vmatpush3.bf16.msra.mxu0 %v915_v21 }
  0x18   :  { %800 = vmatprep.subr.bf16.mxu0 %v918_v24 }
  0x19   :  { %821 = vmatpush3.bf16.msra.mxu1 %v917_v23 }
  0x1a   :  { %822 = vmatprep.subr.bf16.mxu1 %v920_v26 }
  0x1b   :  { %801 = vmatpush3.bf16.msra.mxu0 %v919_v25 }
  0x1c   :  { %802 = vmatprep.subr.bf16.mxu0 %v922_v28 }
  0x1d   :  { %823 = vmatpush3.bf16.msra.mxu1 %v921_v27 }
  0x1e   :  { %824 = vmatprep.subr.bf16.mxu1 %v924_v30 }
  0x1f   :  { %803 = vmatpush3.bf16.msra.mxu0 %v923_v29 }
  0x20   :  { %832 = vmatprep.subr.bf16.mxu0 %v926_v36 }
  0x21   :  { %825 = vmatpush3.bf16.msra.mxu1 %v925_v33 }
  0x22   :  { %472 = vmatmul.mubr.bf16.vlgmr.msra.gmra.mrb[0].mxu0 %v29_v35  ;;  %865 = vmatprep.subr.bf16.mxu1 %v975_v44 }
  0x23   :  { %833 = vmatpush3.bf16.msra.mxu0 %v927_v39  ;;  %551 = vmatprep.mubr.bf16.mxu0 %v34_v56 }
  0x24   :  { %512 = vmatmul.mubr.bf16.vlgmr.msra.gmra.mrb[0].mxu1 %v31_v41  ;;  %834 = vmatprep.subr.bf16.mxu0 %v928_v42 }
  0x25   :  { %867 = vmatprep.mubr.msk.bf16.mxu1 %vm976_vm0, %v975_v44  ;;  %866 = vmatpush3.bf16.msra.mxu1 %v942_v53 }
  0x26   :  { %871 = vmatprep.subr.bf16.mxu1 %v975_v44 }
  0x27   :  { %835 = vmatpush3.bf16.msra.mxu0 %v929_v43 }
  0x28   :  { %836 = vmatprep.subr.bf16.mxu0 %v930_v45 }
  0x2b   :  { %837 = vmatpush3.bf16.msra.mxu0 %v931_v46 }
  0x2c   :  { %838 = vmatprep.subr.bf16.mxu0 %v932_v47  ;;  %868 = vmatmul.mubr.msk.bf16.vlgmr.msra.gmra.mrb[4].mxu1 %vm435_vm1, %v35_v58 }
  0x2d   :  { %887 = vmatprep.mubr.msk.bf16.mxu1 %vm976_vm0, %v975_v44 }
  0x2f   :  { %839 = vmatpush3.bf16.msra.mxu0 %v933_v48 }
  0x30   :  { %840 = vmatprep.subr.bf16.mxu0 %v934_v49 }
  0x33   :  { %841 = vmatpush3.bf16.msra.mxu0 %v935_v50 }
  0x34   :  { %842 = vmatprep.subr.bf16.mxu0 %v936_v51 }
  0x37   :  { %843 = vmatpush3.bf16.msra.mxu0 %v937_v52 }
  0x38   :  { %10 = vsyncpa [#allocation3], 0  ;;  %844 = vmatprep.subr.bf16.mxu0 %v938_v55  ;;  %v940_v60 = vld [vmem:[%s1232_s1 + $0x178] sm:$0xff]   ;;  %v26_v62 = vld [vmem:[%s1231_s0 + $0x20] sm:$0xff]  ;;  %s977_s21 = smov [#allocation2]   ;;  %vm712_vm2 = vcmask 80896  }
  0x39   :  { %v941_v61 = vld [vmem:[%s1232_s1 + $0x138] sm:$0xff]   ;;  %v33_v63 = vpack.c.bf16 %v26_v62, %v26_v62  ;;  %v943_v0 = vld [vmem:[%s1234_s3] sm:$0xff]   ;;  %v944_v1 = vld [vmem:[%s1234_s3 + $0x8] sm:$0xff]   ;;  %s720_s22 = sshll.u32 %s977_s21, 4  ;;  %s721_s22 = int_to_ptr.vmem [resolvable:$true] %s720_s22 }
  0x3a   :  { %872 = vmatpush3.bf16.msra.mxu1 %v943_v0  ;;  %v945_v2 = vld [vmem:[%s1234_s3 + $0x10] sm:$0xff]   ;;  %v946_v3 = vld [vmem:[%s1234_s3 + $0x18] sm:$0xff]   ;;  %v947_v4 = vld [vmem:[%s1234_s3 + $0x20] sm:$0xff]   ;;  %s951_s23 = scalar_lea.vmem %s721_s22, 128  ;;  %p956_p1 = scmp.lt.s32.totalorder %s721_s22, %s721_s22 }
  0x3b   :  { %845 = vmatpush3.bf16.msra.mxu0 %v939_v59  ;;  %873 = vmatprep.subr.bf16.mxu1 %v975_v44  ;;  %v948_v5 = vld [vmem:[%s1234_s3 + $0x28] sm:$0xff]   ;;  %v949_v6 = vld [vmem:[%s1234_s3 + $0x30] sm:$0xff]   ;;  %v950_v7 = vld [vmem:[%s1234_s3 + $0x38] sm:$0xff]   ;;  %p952_p0 = scmp.ne.s32.totalorder %s721_s22, %s951_s23  ;;  %p957_p2 = scmp.lt.s32.totalorder %s951_s23, %s951_s23 }
  0x3c   :  { %846 = vmatprep.subr.bf16.mxu0 %v940_v60  ;;  %v728_v9 = vld [vmem:[%s1233_s2] ss:$0 sm:$0xff] }
  0x3d   :  { %v779_v34 = vld [vmem:[%s1235_s4] ss:$0 sm:$0xff]  ;;  %p958_p3 = por %p957_p2, %p956_p1 }
  0x3e   :  { %874 = vmatpush3.bf16.msra.mxu1 %v944_v1 }
  0x3f   :  { %847 = vmatpush3.bf16.msra.mxu0 %v941_v61  ;;  %875 = vmatprep.subr.bf16.mxu1 %v975_v44  ;;  %p959_p4 = pnand %p958_p3, %p952_p0 }
  0x42   :  { %552 = vmatmul.mubr.bf16.vlgmr.msra.gmra.mrb[4].mxu0 %v33_v63  ;;  %876 = vmatpush3.bf16.msra.mxu1 %v945_v2 }
  0x43   :  { %877 = vmatprep.subr.bf16.mxu1 %v975_v44 }
  0x46   :  { %878 = vmatpush3.bf16.msra.mxu1 %v946_v3 }
  0x47   :  { %879 = vmatprep.subr.bf16.mxu1 %v975_v44 }
  0x4a   :  { %880 = vmatpush3.bf16.msra.mxu1 %v947_v4 }
  0x4b   :  { %881 = vmatprep.subr.bf16.mxu1 %v975_v44 }
  0x4e   :  { %882 = vmatpush3.bf16.msra.mxu1 %v948_v5 }
  0x4f   :  { %883 = vmatprep.subr.bf16.mxu1 %v975_v44 }
  0x52   :  { %884 = vmatpush3.bf16.msra.mxu1 %v949_v6 }
  0x53   :  { %885 = vmatprep.subr.bf16.mxu1 %v975_v44 }
  0x56   :  { %886 = vmatpush3.bf16.msra.mxu1 %v950_v7 }
  0xf5   :  { %v804_v8 = vpop.f32.mrb[0].mxu0 }
  0xf6   :  { %v805_v10 = vpop.f32.mrb[1].mxu0 }
  0xf7   :  { %v806_v11 = vadd.f32 %v805_v10, %v804_v8  ;;  %v807_v12 = vpop.f32.mrb[2].mxu0  ;;  %v826_v13 = vpop.f32.mrb[0].mxu1 }
  0xf8   :  { %v808_v14 = vpop.f32.mrb[3].mxu0  ;;  %v827_v16 = vpop.f32.mrb[1].mxu1 }
  0xf9   :  { %v474_v15 = vadd.f32 %v806_v11, %v728_v9  ;;  %v828_v17 = vadd.f32 %v827_v16, %v826_v13  ;;  %v829_v18 = vpop.f32.mrb[2].mxu1 }
  0xfa   :  { %v830_v19 = vpop.f32.mrb[3].mxu1 }
  0xfb   :  { %v514_v20 = vadd.f32 %v828_v17, %v474_v15 }
  0xff   :  { %v593_v21 = vpop.f32.mrb[4].mxu1 }
 0x100   :  { %v869_v22 = vpop.f32.mrb[5].mxu1 }
 0x101   :  { %v596_v23 = vpop.f32.mrb[6].mxu1 }
 0x102   :  { %v870_v24 = vpop.f32.mrb[7].mxu1 }
 0x115   :  { %v848_v25 = vpop.f32.mrb[4].mxu0 }
 0x116   :  { %v849_v26 = vpop.f32.mrb[5].mxu0 }
 0x117   :  { %v850_v27 = vadd.f32 %v849_v26, %v848_v25  ;;  %v851_v28 = vpop.f32.mrb[6].mxu0 }
 0x118   :  { %v852_v29 = vpop.f32.mrb[7].mxu0 }
 0x119   :  { %v554_v30 = vadd.f32 %v850_v27, %v514_v20 }
 0x11b   :  { %v594_v31 = vadd.f32 %v593_v21, %v554_v30 }
 0x11d   :  { %v599_v32 = vmax.f32 %v594_v31, 0.0 }
 0x11f   :  { %v600_v33 = vpack.c.bf16 %v599_v32, %v599_v32 }
 0x121   :  { %888 = vmatmul.mubr.bf16.vlgmr.msra.gmra.mrb[8].mxu1 %v600_v33 }
 0x1f4   :  { %v706_v35 = vpop.f32.mrb[8].mxu1 }
 0x1f5   :  { %v707_v36 = vadd.f32 %v779_v34, %v706_v35  ;;  %v889_v37 = vpop.f32.mrb[9].mxu1 }
 0x1f6   :  { %v709_v38 = vpop.f32.mrb[10].mxu1 }
 0x1f7   :  { %v890_v39 = vpop.f32.mrb[11].mxu1  ;;  %713 = vst.msk [vmem:[#allocation2] sm:$0xff] %vm712_vm2, %v707_v36 }
 0x1f8   :  { %962 = shalt.err (!%p959_p4)
}
 0x1f9   :  { %s963_s4 = scalar_lea.hbm %s1236_s5, 128 }
 0x1fa   :  { %p964_p5 = scmp.ne.s32.totalorder %s1236_s5, %s963_s4  ;;  %p967_p6 = scmp.lt.u32.totalorder %s963_s4, %s1236_s5 }
 0x1fc   :  { %p969_p7 = pnand %p967_p6, %p964_p5 }
 0x1fe   :  { %972 = shalt.err (!%p969_p7)
}
 0x1ff   :  { %723 = dma.vmem_to_hbm [thread:$0]  %s721_s22, 128, %s1236_s5, [#allocation3]  }
 0x200   :  { %973 = dma.done.wait [#allocation3], 128  }
 0x201   :  { %974 = vsyncadd [#allocation3], 4294967168 }
 0x202   :  { %727 = vsyncpa [#allocation3], 1 }

</bundles_post_ra>
